<compile_context>
chip_gen: v7x
topology: tpu7x:2x2x1
jax: 0.10.0
libtpu: 0.0.40
codegen_flags: <defaults>
</compile_context>

<pallas_src>
import functools

import jax
import jax.numpy as jnp
from jax.experimental import pallas as pl
from jax.experimental.pallas import tpu as pltpu


def _round_up(a, m):
    return (a + m - 1) // m * m


def ffn_kernel(x_ref, g_ref, beta_ref, w1_ref, b1_ref, w2_ref, b2_ref, o_ref,
               inp_scr, acc_scr, *, d_model, mxu_dtype):
    """Grid = (row_tiles, d_inner_tiles).  k (axis 1) is the reduction axis."""
    k = pl.program_id(1)

    @pl.when(k == 0)
    def _():
        # LayerNorm over the true d_model (padded lanes of x are zero).
        x = x_ref[...]                                   # (tile_n, Dp) f32
        inv_d = 1.0 / d_model
        mu = jnp.sum(x, axis=-1, keepdims=True) * inv_d
        xc = x - mu
        if x.shape[-1] != d_model:
            # Keep zero-padded lanes out of the variance.
            lane = jax.lax.broadcasted_iota(jnp.int32, x.shape, dimension=1)
            xc = jnp.where(lane < d_model, xc, 0.0)
        var = jnp.sum(xc * xc, axis=-1, keepdims=True) * inv_d
        inp = xc * jax.lax.rsqrt(var + 1e-5)
        inp = inp * g_ref[...] + beta_ref[...]           # gamma/beta zero-padded
        inp_scr[...] = inp.astype(mxu_dtype)             # cached for all k chunks
        acc_scr[...] = jnp.zeros_like(acc_scr)

    # ff1 chunk + ReLU (dropout = identity in eval mode), then ff2 chunk.
    h = jnp.dot(inp_scr[...], w1_ref[...], preferred_element_type=jnp.float32)
    h = jnp.maximum(h + b1_ref[...], 0.0)                # bias/ReLU in f32
    acc_scr[...] += jnp.dot(h.astype(mxu_dtype), w2_ref[...],
                            preferred_element_type=jnp.float32)

    @pl.when(k == pl.num_programs(1) - 1)
    def _():
        # residual + ff2 bias, all in f32
        o_ref[...] = (x_ref[...] + acc_scr[...] + b2_ref[...]).astype(o_ref.dtype)


def ffn_forward(x, gamma, beta, w1, b1, w2, b2, *,
                tile_n=256, tile_k=512, mxu_dtype=jnp.bfloat16):
    """x: (seq, batch, d_model).  w1: (d_model, d_inner) == ff1.weight.T,
    w2: (d_inner, d_model) == ff2.weight.T."""
    seq, bsz, d_model = x.shape
    d_inner = w1.shape[1]
    n = seq * bsz

    # Lane-dense padding for activations / weights.
    d_model_p = _round_up(d_model, 128)
    d_inner_p = _round_up(d_inner, 128)

    # d_inner tile: multiple of 128 that divides the padded hidden dim.
    tile_k = min(tile_k, d_inner_p)
    while d_inner_p % tile_k != 0:
        tile_k -= 128

    # Row tile: multiple of 16 (bf16 sublane packing); don't exceed the problem.
    tile_n = max(16, min(tile_n, _round_up(n, 16)))
    n_p = _round_up(n, tile_n)

    f32 = jnp.float32
    x2d = jnp.pad(x.reshape(n, d_model).astype(f32),
                  ((0, n_p - n), (0, d_model_p - d_model)))
    g2d = jnp.pad(gamma.reshape(1, d_model).astype(f32),
                  ((0, 0), (0, d_model_p - d_model)))
    be2d = jnp.pad(beta.reshape(1, d_model).astype(f32),
                   ((0, 0), (0, d_model_p - d_model)))
    # Weights cast to the MXU dtype up front (halves the weight DMA bytes).
    w1p = jnp.pad(w1.astype(f32),
                  ((0, d_model_p - d_model), (0, d_inner_p - d_inner))).astype(mxu_dtype)
    b1p = jnp.pad(b1.reshape(1, d_inner).astype(f32),
                  ((0, 0), (0, d_inner_p - d_inner)))
    w2p = jnp.pad(w2.astype(f32),
                  ((0, d_inner_p - d_inner), (0, d_model_p - d_model))).astype(mxu_dtype)
    b2p = jnp.pad(b2.reshape(1, d_model).astype(f32),
                  ((0, 0), (0, d_model_p - d_model)))

    grid = (n_p // tile_n, d_inner_p // tile_k)

    kernel = functools.partial(ffn_kernel, d_model=d_model, mxu_dtype=mxu_dtype)

    out2d = pl.pallas_call(
        kernel,
        out_shape=jax.ShapeDtypeStruct((n_p, d_model_p), x.dtype),
        grid_spec=pltpu.PrefetchScalarGridSpec(
            num_scalar_prefetch=0,
            grid=grid,
            in_specs=[
                pl.BlockSpec((tile_n, d_model_p), lambda i, k: (i, 0)),   # x rows
                pl.BlockSpec((1, d_model_p), lambda i, k: (0, 0)),        # gamma
                pl.BlockSpec((1, d_model_p), lambda i, k: (0, 0)),        # beta
                pl.BlockSpec((d_model_p, tile_k), lambda i, k: (0, k)),   # W1 chunk
                pl.BlockSpec((1, tile_k), lambda i, k: (0, k)),           # b1 chunk
                pl.BlockSpec((tile_k, d_model_p), lambda i, k: (k, 0)),   # W2 chunk
                pl.BlockSpec((1, d_model_p), lambda i, k: (0, 0)),        # b2
            ],
            out_specs=pl.BlockSpec((tile_n, d_model_p), lambda i, k: (i, 0)),
            scratch_shapes=[
                pltpu.VMEM((tile_n, d_model_p), mxu_dtype),   # cached LN output
                pltpu.VMEM((tile_n, d_model_p), jnp.float32),  # f32 accumulator
            ],
        ),
        compiler_params=pltpu.CompilerParams(
            dimension_semantics=("parallel", "arbitrary"),
            vmem_limit_bytes=48 * 1024 * 1024),
    )(x2d, g2d, be2d, w1p, b1p, w2p, b2p)

    return out2d[:n, :d_model].reshape(seq, bsz, d_model)


def ffn_reference(x, gamma, beta, w1, b1, w2, b2):
    """Exact f32 torch semantics."""
    mu = jnp.mean(x, axis=-1, keepdims=True)
    xc = x - mu
    var = jnp.mean(xc * xc, axis=-1, keepdims=True)
    inp = xc * jax.lax.rsqrt(var + 1e-5) * gamma + beta
    h = jax.nn.relu(inp @ w1 + b1)
    return x + (h @ w2 + b2)


def ffn_reference_mxu(x, gamma, beta, w1, b1, w2, b2, mxu_dtype):
    """Reference mirroring the kernel's bf16 MXU operands + f32 accumulation."""
    mu = jnp.mean(x, axis=-1, keepdims=True)
    xc = x - mu
    var = jnp.mean(xc * xc, axis=-1, keepdims=True)
    inp = xc * jax.lax.rsqrt(var + 1e-5) * gamma + beta
    h = jnp.maximum(
        jnp.dot(inp.astype(mxu_dtype), w1.astype(mxu_dtype),
                preferred_element_type=jnp.float32) + b1, 0.0)
    out2 = jnp.dot(h.astype(mxu_dtype), w2.astype(mxu_dtype),
                   preferred_element_type=jnp.float32) + b2
    return x + out2


if __name__ == "__main__":
    # Small shapes consistent with the module: seq=8, batch=2, d_model=32, d_inner=64
    seq, bsz, d_model, d_inner = 8, 2, 32, 64

    key = jax.random.PRNGKey(0)
    kx, kw1, kb1, kw2, kb2 = jax.random.split(key, 5)

    x = jax.random.normal(kx, (seq, bsz, d_model), dtype=jnp.float32)

    # Linear weights stored transposed: w1 == ff1_net.weight.T, w2 == ff2_net.weight.T
    w1 = jax.random.normal(kw1, (d_model, d_inner), dtype=jnp.float32) * 0.05
    b1 = jax.random.normal(kb1, (d_inner,), dtype=jnp.float32) * 0.05
    w2 = jax.random.normal(kw2, (d_inner, d_model), dtype=jnp.float32) * 0.05
    b2 = jax.random.normal(kb2, (d_model,), dtype=jnp.float32) * 0.05
    gamma = jnp.ones((d_model,), dtype=jnp.float32)   # nn.LayerNorm default weight
    beta = jnp.zeros((d_model,), dtype=jnp.float32)   # nn.LayerNorm default bias

    out = ffn_forward(x, gamma, beta, w1, b1, w2, b2)
    out = jax.block_until_ready(out)
    assert out.shape == x.shape

    # Tight check against a reference with the same bf16-MXU / f32-accumulate path.
    ref_mxu = ffn_reference_mxu(x, gamma, beta, w1, b1, w2, b2, jnp.bfloat16)
    assert jnp.allclose(out, ref_mxu, atol=5e-3, rtol=5e-3), \
        float(jnp.max(jnp.abs(out - ref_mxu)))

    # Sanity check against the exact f32 torch semantics (bf16 rounding only).
    ref_f32 = ffn_reference(x, gamma, beta, w1, b1, w2, b2)
    assert jnp.allclose(out, ref_f32, atol=3e-2, rtol=3e-2), \
        float(jnp.max(jnp.abs(out - ref_f32)))

    print("KERNEL_OK")
</pallas_src>

<mosaic_0001>
module attributes {stable_mosaic.version = 11 : i64} {
  func.func @ffn_kernel(%arg0: i32, %arg1: i32, %arg2: memref<16x128xf32, #tpu.memory_space<vmem>>, %arg3: memref<1x128xf32, #tpu.memory_space<vmem>>, %arg4: memref<1x128xf32, #tpu.memory_space<vmem>>, %arg5: memref<128x128xbf16, #tpu.memory_space<vmem>>, %arg6: memref<1x128xf32, #tpu.memory_space<vmem>>, %arg7: memref<128x128xbf16, #tpu.memory_space<vmem>>, %arg8: memref<1x128xf32, #tpu.memory_space<vmem>>, %arg9: memref<16x128xf32, #tpu.memory_space<vmem>>, %arg10: memref<16x128xbf16, #tpu.memory_space<vmem>>, %arg11: memref<16x128xf32, #tpu.memory_space<vmem>>) attributes {dimension_semantics = [#tpu.dimension_semantics<parallel>, #tpu.dimension_semantics<arbitrary>], iteration_bounds = array<i64: 1, 1>, scalar_prefetch = 0 : i64, scratch_operands = 2 : i64, tpu.core_type = #tpu.core_type<tc>, window_params = [{transform_indices = @transform_0, window_bounds = array<i64: 16, 128>}, {pipeline_mode = #tpu.pipeline_mode<synchronous>, transform_indices = @transform_1, window_bounds = array<i64: 1, 128>}, {pipeline_mode = #tpu.pipeline_mode<synchronous>, transform_indices = @transform_2, window_bounds = array<i64: 1, 128>}, {transform_indices = @transform_3, window_bounds = array<i64: 128, 128>}, {transform_indices = @transform_4, window_bounds = array<i64: 1, 128>}, {transform_indices = @transform_5, window_bounds = array<i64: 128, 128>}, {pipeline_mode = #tpu.pipeline_mode<synchronous>, transform_indices = @transform_6, window_bounds = array<i64: 1, 128>}, {transform_indices = @transform_7, window_bounds = array<i64: 16, 128>}]} {
    %c0_i32 = arith.constant 0 : i32
    %0 = arith.cmpi eq, %arg1, %c0_i32 : i32
    %1 = arith.extui %0 : i1 to i32
    %c0_i32_0 = arith.constant 0 : i32
    %2 = arith.cmpi ne, %1, %c0_i32_0 : i32
    scf.if %2 {
      %c0_16 = arith.constant 0 : index
      %c0_17 = arith.constant 0 : index
      %20 = vector.load %arg2[%c0_16, %c0_17] : memref<16x128xf32, #tpu.memory_space<vmem>>, vector<16x128xf32>
      %cst_18 = arith.constant dense<0.000000e+00> : vector<16xf32>
      %21 = vector.multi_reduction <add>, %20, %cst_18 [1] : vector<16x128xf32> to vector<16xf32>
      %22 = vector.shape_cast %21 : vector<16xf32> to vector<16x1xf32>
      %cst_19 = arith.constant 3.125000e-02 : f32
      %23 = vector.broadcast %cst_19 : f32 to vector<16x1xf32>
      %24 = arith.mulf %22, %23 : vector<16x1xf32>
      %25 = vector.broadcast %24 : vector<16x1xf32> to vector<16x128xf32>
      %26 = arith.subf %20, %25 : vector<16x128xf32>
      %27 = tpu.iota {dimensions = array<i32: 1>} : vector<16x128xi32>
      %c32_i32 = arith.constant 32 : i32
      %28 = vector.broadcast %c32_i32 : i32 to vector<16x128xi32>
      %29 = arith.cmpi slt, %27, %28 : vector<16x128xi32>
      %cst_20 = arith.constant 0.000000e+00 : f32
      %30 = vector.broadcast %cst_20 : f32 to vector<16x128xf32>
      %31 = arith.select %29, %26, %30 : vector<16x128xi1>, vector<16x128xf32>
      %32 = arith.mulf %31, %31 : vector<16x128xf32>
      %cst_21 = arith.constant dense<0.000000e+00> : vector<16xf32>
      %33 = vector.multi_reduction <add>, %32, %cst_21 [1] : vector<16x128xf32> to vector<16xf32>
      %34 = vector.shape_cast %33 : vector<16xf32> to vector<16x1xf32>
      %cst_22 = arith.constant 3.125000e-02 : f32
      %35 = vector.broadcast %cst_22 : f32 to vector<16x1xf32>
      %36 = arith.mulf %34, %35 : vector<16x1xf32>
      %cst_23 = arith.constant 9.99999974E-6 : f32
      %37 = vector.broadcast %cst_23 : f32 to vector<16x1xf32>
      %38 = arith.addf %36, %37 : vector<16x1xf32>
      %39 = math.rsqrt %38 : vector<16x1xf32>
      %40 = vector.broadcast %39 : vector<16x1xf32> to vector<16x128xf32>
      %41 = arith.mulf %31, %40 : vector<16x128xf32>
      %c0_24 = arith.constant 0 : index
      %c0_25 = arith.constant 0 : index
      %42 = vector.load %arg3[%c0_24, %c0_25] : memref<1x128xf32, #tpu.memory_space<vmem>>, vector<1x128xf32>
      %43 = vector.broadcast %42 : vector<1x128xf32> to vector<16x128xf32>
      %44 = arith.mulf %41, %43 : vector<16x128xf32>
      %c0_26 = arith.constant 0 : index
      %c0_27 = arith.constant 0 : index
      %45 = vector.load %arg4[%c0_26, %c0_27] : memref<1x128xf32, #tpu.memory_space<vmem>>, vector<1x128xf32>
      %46 = vector.broadcast %45 : vector<1x128xf32> to vector<16x128xf32>
      %47 = arith.addf %44, %46 : vector<16x128xf32>
      %48 = arith.truncf %47 : vector<16x128xf32> to vector<16x128xbf16>
      %c0_28 = arith.constant 0 : index
      %c0_29 = arith.constant 0 : index
      %49 = vector.load %arg10[%c0_28, %c0_29] : memref<16x128xbf16, #tpu.memory_space<vmem>>, vector<16x128xbf16>
      tpu.vector_store %arg10[%c0_28, %c0_29], %48 {strides = array<i32>} : memref<16x128xbf16, #tpu.memory_space<vmem>>, vector<16x128xbf16>,
      %cst_30 = arith.constant 0.000000e+00 : f32
      %50 = vector.broadcast %cst_30 : f32 to vector<16x128xf32>
      %c0_31 = arith.constant 0 : index
      %c0_32 = arith.constant 0 : index
      %51 = vector.load %arg11[%c0_31, %c0_32] : memref<16x128xf32, #tpu.memory_space<vmem>>, vector<16x128xf32>
      tpu.vector_store %arg11[%c0_31, %c0_32], %50 {strides = array<i32>} : memref<16x128xf32, #tpu.memory_space<vmem>>, vector<16x128xf32>,
    } else {
    }
    %c0 = arith.constant 0 : index
    %c0_1 = arith.constant 0 : index
    %3 = vector.load %arg10[%c0, %c0_1] : memref<16x128xbf16, #tpu.memory_space<vmem>>, vector<16x128xbf16>
    %c0_2 = arith.constant 0 : index
    %c0_3 = arith.constant 0 : index
    %4 = vector.load %arg5[%c0_2, %c0_3] : memref<128x128xbf16, #tpu.memory_space<vmem>>, vector<128x128xbf16>
    %cst = arith.constant dense<0.000000e+00> : vector<16x128xf32>
    %5 = tpu.matmul %3, %4, %cst {dimension_numbers = #tpu.dot_dimension_numbers<[1], [0], [0], [1], [0, 0, 1, 1], [], []>} : vector<16x128xbf16>, vector<128x128xbf16>, vector<16x128xf32> -> vector<16x128xf32>
    %c0_4 = arith.constant 0 : index
    %c0_5 = arith.constant 0 : index
    %6 = vector.load %arg6[%c0_4, %c0_5] : memref<1x128xf32, #tpu.memory_space<vmem>>, vector<1x128xf32>
    %7 = vector.broadcast %6 : vector<1x128xf32> to vector<16x128xf32>
    %8 = arith.addf %5, %7 : vector<16x128xf32>
    %cst_6 = arith.constant 0.000000e+00 : f32
    %9 = vector.broadcast %cst_6 : f32 to vector<16x128xf32>
    %10 = arith.maximumf %8, %9 : vector<16x128xf32>
    %c0_7 = arith.constant 0 : index
    %c0_8 = arith.constant 0 : index
    %11 = vector.load %arg11[%c0_7, %c0_8] : memref<16x128xf32, #tpu.memory_space<vmem>>, vector<16x128xf32>
    %12 = arith.truncf %10 : vector<16x128xf32> to vector<16x128xbf16>
    %c0_9 = arith.constant 0 : index
    %c0_10 = arith.constant 0 : index
    %13 = vector.load %arg7[%c0_9, %c0_10] : memref<128x128xbf16, #tpu.memory_space<vmem>>, vector<128x128xbf16>
    %cst_11 = arith.constant dense<0.000000e+00> : vector<16x128xf32>
    %14 = tpu.matmul %12, %13, %cst_11 {dimension_numbers = #tpu.dot_dimension_numbers<[1], [0], [0], [1], [0, 0, 1, 1], [], []>} : vector<16x128xbf16>, vector<128x128xbf16>, vector<16x128xf32> -> vector<16x128xf32>
    %15 = arith.addf %11, %14 : vector<16x128xf32>
    %c0_12 = arith.constant 0 : index
    %c0_13 = arith.constant 0 : index
    %16 = vector.load %arg11[%c0_12, %c0_13] : memref<16x128xf32, #tpu.memory_space<vmem>>, vector<16x128xf32>
    tpu.vector_store %arg11[%c0_12, %c0_13], %15 {strides = array<i32>} : memref<16x128xf32, #tpu.memory_space<vmem>>, vector<16x128xf32>,
    %c0_i32_14 = arith.constant 0 : i32
    %17 = arith.cmpi eq, %arg1, %c0_i32_14 : i32
    %18 = arith.extui %17 : i1 to i32
    %c0_i32_15 = arith.constant 0 : i32
    %19 = arith.cmpi ne, %18, %c0_i32_15 : i32
    scf.if %19 {
      %c0_16 = arith.constant 0 : index
      %c0_17 = arith.constant 0 : index
      %20 = vector.load %arg2[%c0_16, %c0_17] : memref<16x128xf32, #tpu.memory_space<vmem>>, vector<16x128xf32>
      %c0_18 = arith.constant 0 : index
      %c0_19 = arith.constant 0 : index
      %21 = vector.load %arg11[%c0_18, %c0_19] : memref<16x128xf32, #tpu.memory_space<vmem>>, vector<16x128xf32>
      %22 = arith.addf %20, %21 : vector<16x128xf32>
      %c0_20 = arith.constant 0 : index
      %c0_21 = arith.constant 0 : index
      %23 = vector.load %arg8[%c0_20, %c0_21] : memref<1x128xf32, #tpu.memory_space<vmem>>, vector<1x128xf32>
      %24 = vector.broadcast %23 : vector<1x128xf32> to vector<16x128xf32>
      %25 = arith.addf %22, %24 : vector<16x128xf32>
      %c0_22 = arith.constant 0 : index
      %c0_23 = arith.constant 0 : index
      %26 = vector.load %arg9[%c0_22, %c0_23] : memref<16x128xf32, #tpu.memory_space<vmem>>, vector<16x128xf32>
      tpu.vector_store %arg9[%c0_22, %c0_23], %25 {strides = array<i32>} : memref<16x128xf32, #tpu.memory_space<vmem>>, vector<16x128xf32>,
    } else {
    }
    return
  }
  func.func @transform_0(%arg0: i32, %arg1: i32) -> (i32, i32) {
    %c0_i32 = arith.constant 0 : i32
    %c0_i32_0 = arith.constant 0 : i32
    return %arg0, %c0_i32 : i32, i32
  }
  func.func @transform_1(%arg0: i32, %arg1: i32) -> (i32, i32) {
    %c0_i32 = arith.constant 0 : i32
    %c0_i32_0 = arith.constant 0 : i32
    %c0_i32_1 = arith.constant 0 : i32
    return %c0_i32, %c0_i32_0 : i32, i32
  }
  func.func @transform_2(%arg0: i32, %arg1: i32) -> (i32, i32) {
    %c0_i32 = arith.constant 0 : i32
    %c0_i32_0 = arith.constant 0 : i32
    %c0_i32_1 = arith.constant 0 : i32
    return %c0_i32, %c0_i32_0 : i32, i32
  }
  func.func @transform_3(%arg0: i32, %arg1: i32) -> (i32, i32) {
    %c0_i32 = arith.constant 0 : i32
    %c0_i32_0 = arith.constant 0 : i32
    return %c0_i32, %arg1 : i32, i32
  }
  func.func @transform_4(%arg0: i32, %arg1: i32) -> (i32, i32) {
    %c0_i32 = arith.constant 0 : i32
    %c0_i32_0 = arith.constant 0 : i32
    return %c0_i32, %arg1 : i32, i32
  }
  func.func @transform_5(%arg0: i32, %arg1: i32) -> (i32, i32) {
    %c0_i32 = arith.constant 0 : i32
    %c0_i32_0 = arith.constant 0 : i32
    return %arg1, %c0_i32 : i32, i32
  }
  func.func @transform_6(%arg0: i32, %arg1: i32) -> (i32, i32) {
    %c0_i32 = arith.constant 0 : i32
    %c0_i32_0 = arith.constant 0 : i32
    %c0_i32_1 = arith.constant 0 : i32
    return %c0_i32, %c0_i32_0 : i32, i32
  }
  func.func @transform_7(%arg0: i32, %arg1: i32) -> (i32, i32) {
    %c0_i32 = arith.constant 0 : i32
    %c0_i32_0 = arith.constant 0 : i32
    return %arg0, %c0_i32 : i32, i32
  }
}

</mosaic_0001>

<bundles_post_ra>
// kernel: tpu_custom_call.1
= control target key start
LH: loop header
LB: loop body
LE: loop exit
PB: predicated region body
PF: predicated region fallthrough
CT: control target
= control target key end

     0   :  { %12 = vsyncpa [#allocation5], 0  ;;  %s741_s0 = inlined_call_operand.hbm [shape: f32[16,128], index: 0, kind: input, shape index: {}]   ;;  %s742_s1 = inlined_call_operand.vmem [shape: f32[1,128], index: 1, kind: input, shape index: {}]   ;;  %s743_s2 = inlined_call_operand.vmem [shape: f32[1,128], index: 2, kind: input, shape index: {}]   ;;  %s744_s3 = inlined_call_operand.hbm [shape: bf16[128,128], index: 3, kind: input, shape index: {}]   ;;  %s745_s4 = inlined_call_operand.vmem [shape: f32[1,128], index: 4, kind: input, shape index: {}]   ;;  %s746_s5 = inlined_call_operand.hbm [shape: bf16[128,128], index: 5, kind: input, shape index: {}]   ;;  %s747_s6 = inlined_call_operand.vmem [shape: f32[1,128], index: 6, kind: input, shape index: {}]   ;;  %s748_s7 = inlined_call_operand.hbm [shape: f32[16,128], index: 7, kind: output, shape index: {}]  }
   0x1   :  { %13 = vsyncpa [#allocation8], 0 }
   0x2   :  { %14 = vsyncpa [#allocation6], 0  ;;  %s591_s24 = smov [#allocation7]   ;;  %s497_s28 = scalar_lea.hbm %s744_s3, 1024 }
   0x3   :  { %s36_s25 = sshll.u32 %s591_s24, 4  ;;  %p498_p0 = scmp.ne.s32.totalorder %s744_s3, %s497_s28  ;;  %s37_s25 = int_to_ptr.vmem [resolvable:$true] %s36_s25 }
   0x4   :  { %p501_p1 = scmp.lt.u32.totalorder %s497_s28, %s744_s3 }
   0x6   :  { %p503_p2 = pnand %p501_p1, %p498_p0 }
   0x8   :  { %506 = shalt.err (!%p503_p2)
}
   0x9   :  { %s507_s10 = scalar_lea.vmem %s37_s25, 1024  ;;  %p512_p4 = scmp.lt.s32.totalorder %s37_s25, %s37_s25 }
   0xa   :  { %p508_p3 = scmp.ne.s32.totalorder %s37_s25, %s507_s10  ;;  %p513_p5 = scmp.lt.s32.totalorder %s507_s10, %s507_s10 }
   0xc   :  { %p514_p6 = por %p513_p5, %p512_p4 }
   0xe   :  { %p515_p7 = pnand %p514_p6, %p508_p3 }
  0x10   :  { %518 = shalt.err (!%p515_p7)
}
  0x11   :  { %s592_s11 = smov 64   ;;  %s593_s12 = smov 4  }
  0x12   :  { %42 = dma.hbm_to_vmem [thread:$0]  %s744_s3, 1024, %s37_s25, [#allocation8], %s592_s11, %s592_s11, %s593_s12  }
  0x13   :  { %s594_s15 = smov [#allocation4]   ;;  %s519_s19 = scalar_lea.hbm %s741_s0, 256 }
  0x14   :  { %s20_s16 = sshll.u32 %s594_s15, 4  ;;  %p520_p8 = scmp.ne.s32.totalorder %s741_s0, %s519_s19  ;;  %s21_s16 = int_to_ptr.vmem [resolvable:$true] %s20_s16 }
  0x15   :  { %p523_p9 = scmp.lt.u32.totalorder %s519_s19, %s741_s0 }
  0x17   :  { %p525_p10 = pnand %p523_p9, %p520_p8 }
  0x19   :  { %528 = shalt.err (!%p525_p10)
}
  0x1a   :  { %s529_s24 = scalar_lea.vmem %s21_s16, 256  ;;  %p534_p12 = scmp.lt.s32.totalorder %s21_s16, %s21_s16 }
  0x1b   :  { %p530_p11 = scmp.ne.s32.totalorder %s21_s16, %s529_s24  ;;  %p535_p13 = scmp.lt.s32.totalorder %s529_s24, %s529_s24 }
  0x1d   :  { %p536_p0 = por %p535_p13, %p534_p12 }
  0x1f   :  { %p537_p1 = pnand %p536_p0, %p530_p11 }
  0x21   :  { %540 = shalt.err (!%p537_p1)
}
  0x22   :  { %s595_s3 = smov 128   ;;  %s596_s25 = smov 8  }
  0x23   :  { %26 = dma.hbm_to_vmem [thread:$0]  %s741_s0, 256, %s21_s16, [#allocation5], %s595_s3, %s595_s3, %s596_s25  }
  0x24   :  { %s597_s28 = smov [#allocation9]   ;;  %s541_s9 = scalar_lea.hbm %s746_s5, 1024 }
  0x25   :  { %s50_s29 = sshll.u32 %s597_s28, 4  ;;  %p542_p2 = scmp.ne.s32.totalorder %s746_s5, %s541_s9  ;;  %s51_s29 = int_to_ptr.vmem [resolvable:$true] %s50_s29 }
  0x26   :  { %p545_p3 = scmp.lt.u32.totalorder %s541_s9, %s746_s5 }
  0x28   :  { %p547_p4 = pnand %p545_p3, %p542_p2 }
  0x2a   :  { %550 = shalt.err (!%p547_p4)
}
  0x2b   :  { %s551_s17 = scalar_lea.vmem %s51_s29, 1024  ;;  %p556_p6 = scmp.lt.s32.totalorder %s51_s29, %s51_s29 }
  0x2c   :  { %p552_p5 = scmp.ne.s32.totalorder %s51_s29, %s551_s17  ;;  %p557_p7 = scmp.lt.s32.totalorder %s551_s17, %s551_s17 }
  0x2e   :  { %p558_p8 = por %p557_p7, %p556_p6 }
  0x30   :  { %p559_p9 = pnand %p558_p8, %p552_p5 }
  0x32   :  { %562 = shalt.err (!%p559_p9)
}
  0x33   :  { %56 = dma.hbm_to_vmem [thread:$0]  %s746_s5, 1024, %s51_s29, [#allocation8], %s592_s11, %s592_s11, %s593_s12  }
  0x34   :  { %585 = dma.done.wait [#allocation5], 256  }
  0x35   :  { %586 = vsyncadd [#allocation5], 4294967040 }
  0x36   :  { %587 = dma.done.wait [#allocation8], 2048  }
  0x37   :  { %588 = vsyncadd [#allocation8], 4294965248  ;;  %v686_v0 = vld [vmem:[#allocation4] sm:$0xff]  ;;  %v688_v1 = vld [vmem:[#allocation4 + $0x8] sm:$0xff]  ;;  %v598_v3 = vmov 0.0   ;;  %v83_v4 = vlaneseq  ;;  %vm599_vm1 = vmmov 0  }
  0x38   :  { %75 = vadd.xlane.f32.xlu0 %v686_v0  ;;  %v477_v2 = vld [vmem:[#allocation7] sm:$0xff]   ;;  %427 = vmatprep.subr.bf16.mxu0 %v598_v3  ;;  %v478_v16 = vld [vmem:[#allocation7 + $0x8] sm:$0xff]   ;;  %v479_v17 = vld [vmem:[#allocation7 + $0x10] sm:$0xff]  }
  0x39   :  { %447 = vmatprep.subr.bf16.mxu1 %v598_v3  ;;  %428 = vmatpush3.bf16.msra.mxu0 %v477_v2  ;;  %v84_v5 = vand.u32 127, %v83_v4  ;;  %v480_v18 = vld [vmem:[#allocation7 + $0x18] sm:$0xff]   ;;  %v481_v19 = vld [vmem:[#allocation7 + $0x20] sm:$0xff]   ;;  %v482_v20 = vld [vmem:[#allocation7 + $0x28] sm:$0xff]  }
  0x3a   :  { %429 = vmatprep.subr.bf16.mxu0 %v598_v3  ;;  %443 = vmatprep.mubr.msk.bf16.mxu0 %vm599_vm1, %v598_v3  ;;  %v483_v21 = vld [vmem:[#allocation7 + $0x30] sm:$0xff]   ;;  %v484_v22 = vld [vmem:[#allocation7 + $0x38] sm:$0xff]   ;;  %v485_v23 = vld [vmem:[#allocation9] sm:$0xff]  }
  0x3b   :  { %vm85_vm0 = vcmp.lt.s32.totalorder %v84_v5, 32  ;;  %463 = vmatprep.mubr.msk.bf16.mxu1 %vm599_vm1, %v598_v3  ;;  %448 = vmatpush3.bf16.msra.mxu1 %v485_v23  ;;  %v486_v24 = vld [vmem:[#allocation9 + $0x8] sm:$0xff]   ;;  %v487_v25 = vld [vmem:[#allocation9 + $0x10] sm:$0xff]   ;;  %v488_v26 = vld [vmem:[#allocation9 + $0x18] sm:$0xff]  }
  0x3c   :  { %77 = vadd.xlane.f32.xlu0 %v688_v1  ;;  %449 = vmatprep.subr.bf16.mxu1 %v598_v3  ;;  %v489_v27 = vld [vmem:[#allocation9 + $0x20] sm:$0xff]   ;;  %v490_v28 = vld [vmem:[#allocation9 + $0x28] sm:$0xff]   ;;  %v389_v37 = vld [vmem:[%s742_s1] ss:$0 sm:$0xff] }
  0x3d   :  { %430 = vmatpush3.bf16.msra.mxu0 %v478_v16  ;;  %v390_v41 = vld [vmem:[%s743_s2] ss:$0 sm:$0xff]  ;;  %v492_v47 = vld [vmem:[#allocation9 + $0x38] sm:$0xff]  }
  0x3e   :  { %431 = vmatprep.subr.bf16.mxu0 %v598_v3  ;;  %v491_v46 = vld [vmem:[#allocation9 + $0x30] sm:$0xff]  }
  0x3f   :  { %450 = vmatpush3.bf16.msra.mxu1 %v486_v24  ;;  %v391_v48 = vld [vmem:[%s745_s4] ss:$0 sm:$0xff]  ;;  %s600_s4 = smov [#allocation10]  }
  0x40   :  { %451 = vmatprep.subr.bf16.mxu1 %v598_v3  ;;  %v408_v59 = vld [vmem:[%s747_s6] ss:$0 sm:$0xff]  ;;  %s376_s21 = sshll.u32 %s600_s4, 4  ;;  %s377_s21 = int_to_ptr.vmem [resolvable:$true] %s376_s21 }
  0x41   :  { %432 = vmatpush3.bf16.msra.mxu0 %v479_v17  ;;  %s563_s22 = scalar_lea.vmem %s377_s21, 256  ;;  %p568_p11 = scmp.lt.s32.totalorder %s377_s21, %s377_s21 }
  0x42   :  { %433 = vmatprep.subr.bf16.mxu0 %v598_v3  ;;  %p564_p10 = scmp.ne.s32.totalorder %s377_s21, %s563_s22  ;;  %p569_p12 = scmp.lt.s32.totalorder %s563_s22, %s563_s22 }
  0x43   :  { %452 = vmatpush3.bf16.msra.mxu1 %v487_v25 }
  0x44   :  { %453 = vmatprep.subr.bf16.mxu1 %v598_v3  ;;  %p570_p13 = por %p569_p12, %p568_p11 }
  0x45   :  { %434 = vmatpush3.bf16.msra.mxu0 %v480_v18 }
  0x46   :  { %435 = vmatprep.subr.bf16.mxu0 %v598_v3  ;;  %p571_p0 = pnand %p570_p13, %p564_p10 }
  0x47   :  { %454 = vmatpush3.bf16.msra.mxu1 %v488_v26 }
  0x48   :  { %455 = vmatprep.subr.bf16.mxu1 %v598_v3 }
  0x49   :  { %436 = vmatpush3.bf16.msra.mxu0 %v481_v19 }
  0x4a   :  { %437 = vmatprep.subr.bf16.mxu0 %v598_v3 }
  0x4b   :  { %456 = vmatpush3.bf16.msra.mxu1 %v489_v27 }
  0x4c   :  { %457 = vmatprep.subr.bf16.mxu1 %v598_v3 }
  0x4d   :  { %438 = vmatpush3.bf16.msra.mxu0 %v482_v20 }
  0x4e   :  { %439 = vmatprep.subr.bf16.mxu0 %v598_v3 }
  0x4f   :  { %458 = vmatpush3.bf16.msra.mxu1 %v490_v28 }
  0x50   :  { %459 = vmatprep.subr.bf16.mxu1 %v598_v3 }
  0x51   :  { %440 = vmatpush3.bf16.msra.mxu0 %v483_v21 }
  0x52   :  { %441 = vmatprep.subr.bf16.mxu0 %v598_v3 }
  0x53   :  { %460 = vmatpush3.bf16.msra.mxu1 %v491_v46 }
  0x54   :  { %461 = vmatprep.subr.bf16.mxu1 %v598_v3 }
  0x55   :  { %442 = vmatpush3.bf16.msra.mxu0 %v484_v22 }
  0x57   :  { %462 = vmatpush3.bf16.msra.mxu1 %v492_v47 }
  0xc5   :  { %v76_v6 = vpop.xlane.xlu0 %75 }
  0xc6   :  { %v79_v7 = vmul.f32 0.03125, %v76_v6 }
  0xc8   :  { %v81_v8 = vsub.f32 %v686_v0, %v79_v7 }
  0xc9   :  { %v78_v9 = vpop.xlane.xlu0 %77 }
  0xca   :  { %v80_v10 = vmul.f32 0.03125, %v78_v9  ;;  %v86_v11 = vsel %vm85_vm0, %v81_v8, 0.0 }
  0xcb   :  { %v88_v12 = vmul.f32 %v86_v11, %v86_v11 }
  0xcc   :  { %v82_v13 = vsub.f32 %v688_v1, %v80_v10 }
  0xcd   :  { %90 = vadd.xlane.f32.xlu1 %v88_v12 }
  0xce   :  { %v87_v14 = vsel %vm85_vm0, %v82_v13, 0.0 }
  0xcf   :  { %v89_v15 = vmul.f32 %v87_v14, %v87_v14 }
  0xd1   :  { %92 = vadd.xlane.f32.xlu1 %v89_v15 }
 0x15a   :  { %v91_v29 = vpop.xlane.xlu1 %90 }
 0x15b   :  { %v94_v30 = vmul.f32 0.03125, %v91_v29 }
 0x15d   :  { %v96_v31 = vadd.f32 1e-05, %v94_v30 }
 0x15e   :  { %v93_v32 = vpop.xlane.xlu1 %92 }
 0x15f   :  { %493 = vrsqrt.f32 %v96_v31  ;;  %v95_v33 = vmul.f32 0.03125, %v93_v32 }
 0x161   :  { %v97_v34 = vadd.f32 1e-05, %v95_v33 }
 0x163   :  { %495 = vrsqrt.f32 %v97_v34 }
 0x169   :  { %v494_v35 = vpop.eup %493 }
 0x16a   :  { %v100_v36 = vmul.f32 %v494_v35, %v86_v11 }
 0x16c   :  { %v109_v40 = vmul.f32 %v389_v37, %v100_v36 }
 0x16d   :  { %v496_v38 = vpop.eup %495 }
 0x16e   :  { %v101_v39 = vmul.f32 %v496_v38, %v87_v14  ;;  %v118_v43 = vadd.f32 %v390_v41, %v109_v40 }
 0x170   :  { %v110_v42 = vmul.f32 %v389_v37, %v101_v39 }
 0x172   :  { %v119_v44 = vadd.f32 %v390_v41, %v110_v42 }
 0x174   :  { %v120_v45 = vpack.c.bf16 %v119_v44, %v118_v43 }
 0x176   :  { %444 = vmatmul.mubr.bf16.vlgmr.msra.gmra.mrb[0].mxu0 %v120_v45 }
 0x249   :  { %v230_v49 = vpop.f32.mrb[0].mxu0 }
 0x24a   :  { %v231_v50 = vadd.f32 %v391_v48, %v230_v49  ;;  %v445_v51 = vpop.f32.mrb[1].mxu0 }
 0x24b   :  { %v233_v52 = vpop.f32.mrb[2].mxu0 }
 0x24c   :  { %v234_v53 = vadd.f32 %v391_v48, %v233_v52  ;;  %v446_v54 = vpop.f32.mrb[3].mxu0  ;;  %v237_v55 = vmax.f32 %v231_v50, 0.0 }
 0x24e   :  { %v238_v56 = vmax.f32 %v234_v53, 0.0 }
 0x250   :  { %v241_v57 = vpack.c.bf16 %v238_v56, %v237_v55 }
 0x252   :  { %464 = vmatmul.mubr.bf16.vlgmr.msra.gmra.mrb[0].mxu1 %v241_v57 }
 0x325   :  { %v340_v58 = vpop.f32.mrb[0].mxu1 }
 0x326   :  { %v358_v60 = vadd.f32 %v340_v58, %v686_v0  ;;  %v465_v61 = vpop.f32.mrb[1].mxu1 }
 0x327   :  { %v343_v62 = vpop.f32.mrb[2].mxu1 }
 0x328   :  { %v367_v63 = vadd.f32 %v408_v59, %v358_v60  ;;  %v359_v2 = vadd.f32 %v343_v62, %v688_v1  ;;  %v466_v3 = vpop.f32.mrb[3].mxu1 }
 0x32a   :  { %369 = vst [vmem:[#allocation10] sm:$0xff] %v367_v63  ;;  %v368_v4 = vadd.f32 %v408_v59, %v359_v2 }
 0x32c   :  { %370 = vst [vmem:[#allocation10 + $0x8] sm:$0xff] %v368_v4 }
 0x32d   :  { %574 = shalt.err (!%p571_p0)
}
 0x32e   :  { %s575_s24 = scalar_lea.hbm %s748_s7, 256 }
 0x32f   :  { %p576_p1 = scmp.ne.s32.totalorder %s748_s7, %s575_s24  ;;  %p579_p2 = scmp.lt.u32.totalorder %s575_s24, %s748_s7 }
 0x331   :  { %p581_p3 = pnand %p579_p2, %p576_p1 }
 0x333   :  { %584 = shalt.err (!%p581_p3)
}
 0x334   :  { %382 = dma.vmem_to_hbm [thread:$0]  %s377_s21, 256, %s748_s7, [#allocation6], %s595_s3, %s595_s3, %s596_s25  }
 0x335   :  { %589 = dma.done.wait [#allocation6], 256  }
 0x336   :  { %590 = vsyncadd [#allocation6], 4294967040 }
 0x337   :  { %386 = vsyncpa [#allocation5], 1 }
 0x338   :  { %387 = vsyncpa [#allocation8], 1 }
 0x339   :  { %388 = vsyncpa [#allocation6], 1 }

</bundles_post_ra>
